<compile_context>
chip_gen: v5e
topology: v5e:2x2
jax: 0.10.0
libtpu: 0.0.40
codegen_flags: <defaults>
</compile_context>

<pallas_src>
import math

import jax
import jax.numpy as jnp
from jax.experimental import pallas as pl
from jax.experimental.pallas import tpu as pltpu


# ----------------------------------------------------------------------------- kernel
def _transition_kernel(x_ref, scale_ref, bias_ref, w_ref, o_ref):
    # x_ref block: (tr, 2, Wo, 2*Cin)   [H-tap, W/2, (W-tap x Cin) lanes]
    xb = x_ref[...]
    tr, _, wo, c2 = xb.shape

    x0 = xb[:, 0].astype(jnp.float32)          # H-tap 0: (tr, Wo, 2*Cin)
    x1 = xb[:, 1].astype(jnp.float32)          # H-tap 1

    # Hoist a single broadcast of the folded-BN scale/bias (JAX doesn't CSE these).
    s = jnp.broadcast_to(scale_ref[0].astype(jnp.float32), x0.shape)
    b = jnp.broadcast_to(bias_ref[0].astype(jnp.float32), x0.shape)

    # BN + ReLU per tap, then sum the two H-taps (W-taps are summed by the matmul
    # because the weight rows are duplicated; 0.25 is folded into the weights).
    act = jnp.maximum(x0 * s + b, 0.0) + jnp.maximum(x1 * s + b, 0.0)

    lhs = act.reshape(tr * wo, c2).astype(w_ref.dtype)
    o_ref[...] = jnp.dot(lhs, w_ref[...],
                         preferred_element_type=jnp.float32).astype(o_ref.dtype)


# ----------------------------------------------------------------------------- tiling helpers
def _vmem_capacity_bytes():
    try:
        info = pltpu.get_tpu_info()
        cap = getattr(info, "vmem_capacity_bytes", None)
        if cap:
            return int(cap)
    except Exception:
        pass
    return 64 * 1024 * 1024  # conservative (v7x-sized) fallback


def _pick_block_rows(R, W, Cin, Cout_pad, itemsize=4):
    """Rows (of N*H/2) per grid step + vmem limit, sized per TPU generation."""
    Wo = W // 2
    vmem_limit = (_vmem_capacity_bytes() * 3) // 4            # 96 MiB v5e/v6e, 48 MiB v7x

    w_bytes = 2 * (2 * Cin) * Cout_pad * itemsize             # (double-buffered) weight
    avail = max(vmem_limit - w_bytes - (1 << 20), vmem_limit // 8)
    per_row = (2 * W * Cin + Wo * Cout_pad) * itemsize        # input + output per R-row
    tr = max(1, avail // (2 * per_row))                       # 2x for double buffering
    tr = min(tr, R)

    # Keep >= 2 grid steps so the single parallel axis can shard across
    # v7x's two TensorCores (and megacore on other gens).
    if tr == R and R > 1:
        tr = -(-R // 2)

    # Output block is (tr*Wo, Cout_pad): keep second-to-last dim a multiple of 8,
    # or fall back to one full-extent block.
    need = 8 // math.gcd(Wo, 8)
    if tr % need != 0:
        tr = (tr // need) * need
        if tr == 0:
            tr = R
    return int(tr), int(vmem_limit)


# ----------------------------------------------------------------------------- wrappers
def transition_block_nhwc(x_nhwc, gamma, beta, running_mean, running_var, weight,
                          eps=1e-5):
    """x_nhwc: (N, H, W, Cin). weight: (Cout, Cin, 1, 1). Returns (N, H/2, W/2, Cout)."""
    N, H, W, Cin = x_nhwc.shape
    Cout = weight.shape[0]
    assert H % 2 == 0 and W % 2 == 0, "2x2 avg-pool needs even spatial dims"
    Ho, Wo = H // 2, W // 2
    R = N * Ho          # rows of pooled output grouped by (n, h_out)
    M = R * Wo          # total pooled pixels

    out_dtype = x_nhwc.dtype
    w_dtype = weight.dtype

    # Fold eval-mode BatchNorm into per-channel scale/bias, duplicated over 2 W-taps.
    scale = (gamma.astype(jnp.float32)
             / jnp.sqrt(running_var.astype(jnp.float32) + eps))
    bias = beta.astype(jnp.float32) - running_mean.astype(jnp.float32) * scale
    scale2 = jnp.concatenate([scale, scale]).reshape(1, 2 * Cin)
    bias2 = jnp.concatenate([bias, bias]).reshape(1, 2 * Cin)

    # 1x1 conv weight -> (Cin, Cout), duplicated over the 2 W-taps, with the 0.25
    # avg-pool factor folded in. Pad Cout to a lane-dense multiple of 128 if needed.
    Cout_pad = ((Cout + 127) // 128) * 128
    w_mat = weight.reshape(Cout, Cin).T                       # (Cin, Cout)
    w2 = (jnp.concatenate([w_mat, w_mat], axis=0) * 0.25).astype(w_dtype)
    if Cout_pad != Cout:
        w2 = jnp.pad(w2, ((0, 0), (0, Cout_pad - Cout)))

    # Zero-copy view exposing the 2x2 pooling window: (R, 2, Wo, 2*Cin).
    x_view = x_nhwc.reshape(R, 2, Wo, 2 * Cin)

    tr, vmem_limit = _pick_block_rows(R, W, Cin, Cout_pad,
                                      itemsize=max(4, x_nhwc.dtype.itemsize))
    grid = (pl.cdiv(R, tr),)   # partial last block: OOB reads ignored, writes masked

    out = pl.pallas_call(
        _transition_kernel,
        out_shape=jax.ShapeDtypeStruct((M, Cout_pad), out_dtype),
        grid=grid,
        in_specs=[
            pl.BlockSpec((tr, 2, Wo, 2 * Cin), lambda i: (i, 0, 0, 0)),
            pl.BlockSpec((1, 2 * Cin), lambda i: (0, 0)),
            pl.BlockSpec((1, 2 * Cin), lambda i: (0, 0)),
            pl.BlockSpec((2 * Cin, Cout_pad), lambda i: (0, 0)),
        ],
        out_specs=pl.BlockSpec((tr * Wo, Cout_pad), lambda i: (i, 0)),
        compiler_params=pltpu.CompilerParams(
            dimension_semantics=("parallel",),
            vmem_limit_bytes=vmem_limit),
    )(x_view, scale2, bias2, w2)

    if Cout_pad != Cout:
        out = out[:, :Cout]
    return out.reshape(N, Ho, Wo, Cout)


def transition_block(x, gamma, beta, running_mean, running_var, weight, eps=1e-5):
    """PyTorch-compatible NCHW interface. x: (N, Cin, H, W) -> (N, Cout, H/2, W/2)."""
    # TODO(synk): feed NHWC activations end-to-end (transition_block_nhwc) to avoid
    # these two full HBM round-trips for the layout transposes.
    x_nhwc = jnp.transpose(x, (0, 2, 3, 1))
    y = transition_block_nhwc(x_nhwc, gamma, beta, running_mean, running_var,
                              weight, eps=eps)
    return jnp.transpose(y, (0, 3, 1, 2))


# ----------------------------------------------------------------------------- reference & test
def _reference(x, gamma, beta, running_mean, running_var, weight, eps=1e-5):
    # Plain-JAX reference in the PyTorch order: BN -> ReLU -> conv1x1 -> avgpool2x2.
    c = x.shape[1]
    g = gamma.reshape(1, c, 1, 1)
    b = beta.reshape(1, c, 1, 1)
    m = running_mean.reshape(1, c, 1, 1)
    v = running_var.reshape(1, c, 1, 1)
    h = (x - m) / jnp.sqrt(v + eps) * g + b
    h = jnp.maximum(h, 0.0)
    y = jnp.einsum('nchw,oc->nohw', h, weight.reshape(weight.shape[0], c))
    N, Co, H, W = y.shape
    return y.reshape(N, Co, H // 2, 2, W // 2, 2).mean(axis=(3, 5))


if __name__ == "__main__":
    key = jax.random.PRNGKey(0)
    k_x, k_w, k_g, k_b, k_m, k_v = jax.random.split(key, 6)

    N, Cin, H, W = 2, 4, 16, 16
    Cout = 8

    x = jax.random.normal(k_x, (N, Cin, H, W), dtype=jnp.float32)
    weight = jax.random.normal(k_w, (Cout, Cin, 1, 1), dtype=jnp.float32) * 0.1
    gamma = 1.0 + 0.1 * jax.random.normal(k_g, (Cin,), dtype=jnp.float32)
    beta = 0.1 * jax.random.normal(k_b, (Cin,), dtype=jnp.float32)
    running_mean = 0.1 * jax.random.normal(k_m, (Cin,), dtype=jnp.float32)
    running_var = jnp.abs(1.0 + 0.1 * jax.random.normal(k_v, (Cin,), dtype=jnp.float32))

    y = transition_block(x, gamma, beta, running_mean, running_var, weight)
    y = jax.block_until_ready(y)

    y_ref = _reference(x, gamma, beta, running_mean, running_var, weight)
    assert y.shape == (N, Cout, H // 2, W // 2), y.shape
    assert jnp.allclose(y, y_ref, atol=1e-5, rtol=1e-5), "mismatch vs reference"

    print("KERNEL_OK")
</pallas_src>

<mosaic_0001>
module attributes {stable_mosaic.version = 11 : i64} {
  func.func @_transition_kernel(%arg0: i32, %arg1: memref<8x2x8x8xf32, #tpu.memory_space<vmem>>, %arg2: memref<1x8xf32, #tpu.memory_space<vmem>>, %arg3: memref<1x8xf32, #tpu.memory_space<vmem>>, %arg4: memref<8x128xf32, #tpu.memory_space<vmem>>, %arg5: memref<64x128xf32, #tpu.memory_space<vmem>>) attributes {dimension_semantics = [#tpu.dimension_semantics<parallel>], iteration_bounds = array<i64: 2>, scalar_prefetch = 0 : i64, scratch_operands = 0 : i64, tpu.core_type = #tpu.core_type<tc>, window_params = [{transform_indices = @transform_0, window_bounds = array<i64: 8, 2, 8, 8>}, {pipeline_mode = #tpu.pipeline_mode<synchronous>, transform_indices = @transform_1, window_bounds = array<i64: 1, 8>}, {pipeline_mode = #tpu.pipeline_mode<synchronous>, transform_indices = @transform_2, window_bounds = array<i64: 1, 8>}, {pipeline_mode = #tpu.pipeline_mode<synchronous>, transform_indices = @transform_3, window_bounds = array<i64: 8, 128>}, {transform_indices = @transform_4, window_bounds = array<i64: 64, 128>}]} {
    %c0 = arith.constant 0 : index
    %c0_0 = arith.constant 0 : index
    %c0_1 = arith.constant 0 : index
    %c0_2 = arith.constant 0 : index
    %0 = vector.load %arg1[%c0, %c0_0, %c0_1, %c0_2] : memref<8x2x8x8xf32, #tpu.memory_space<vmem>>, vector<8x2x8x8xf32>
    %1 = vector.extract_strided_slice %0 {offsets = [0, 0, 0, 0], sizes = [8, 1, 8, 8], strides = [1, 1, 1, 1]} : vector<8x2x8x8xf32> to vector<8x1x8x8xf32>
    %2 = vector.shape_cast %1 : vector<8x1x8x8xf32> to vector<8x8x8xf32>
    %3 = vector.extract_strided_slice %0 {offsets = [0, 1, 0, 0], sizes = [8, 1, 8, 8], strides = [1, 1, 1, 1]} : vector<8x2x8x8xf32> to vector<8x1x8x8xf32>
    %4 = vector.shape_cast %3 : vector<8x1x8x8xf32> to vector<8x8x8xf32>
    %c0_3 = arith.constant 0 : index
    %c0_4 = arith.constant 0 : index
    %5 = vector.load %arg2[%c0_3, %c0_4] : memref<1x8xf32, #tpu.memory_space<vmem>>, vector<1x8xf32>
    %6 = vector.shape_cast %5 : vector<1x8xf32> to vector<8xf32>
    %7 = vector.shape_cast %6 : vector<8xf32> to vector<1x1x8xf32>
    %8 = vector.broadcast %7 : vector<1x1x8xf32> to vector<8x8x8xf32>
    %c0_5 = arith.constant 0 : index
    %c0_6 = arith.constant 0 : index
    %9 = vector.load %arg3[%c0_5, %c0_6] : memref<1x8xf32, #tpu.memory_space<vmem>>, vector<1x8xf32>
    %10 = vector.shape_cast %9 : vector<1x8xf32> to vector<8xf32>
    %11 = vector.shape_cast %10 : vector<8xf32> to vector<1x1x8xf32>
    %12 = vector.broadcast %11 : vector<1x1x8xf32> to vector<8x8x8xf32>
    %13 = arith.mulf %2, %8 : vector<8x8x8xf32>
    %14 = arith.addf %13, %12 : vector<8x8x8xf32>
    %cst = arith.constant 0.000000e+00 : f32
    %15 = vector.broadcast %cst : f32 to vector<8x8x8xf32>
    %16 = arith.maximumf %14, %15 : vector<8x8x8xf32>
    %17 = arith.mulf %4, %8 : vector<8x8x8xf32>
    %18 = arith.addf %17, %12 : vector<8x8x8xf32>
    %cst_7 = arith.constant 0.000000e+00 : f32
    %19 = vector.broadcast %cst_7 : f32 to vector<8x8x8xf32>
    %20 = arith.maximumf %18, %19 : vector<8x8x8xf32>
    %21 = arith.addf %16, %20 : vector<8x8x8xf32>
    %22 = vector.shape_cast %21 : vector<8x8x8xf32> to vector<64x8xf32>
    %c0_8 = arith.constant 0 : index
    %c0_9 = arith.constant 0 : index
    %23 = vector.load %arg4[%c0_8, %c0_9] : memref<8x128xf32, #tpu.memory_space<vmem>>, vector<8x128xf32>
    %cst_10 = arith.constant dense<0.000000e+00> : vector<64x128xf32>
    %24 = tpu.matmul %22, %23, %cst_10 {dimension_numbers = #tpu.dot_dimension_numbers<[1], [0], [0], [1], [0, 0, 1, 1], [], []>} : vector<64x8xf32>, vector<8x128xf32>, vector<64x128xf32> -> vector<64x128xf32>
    %c0_11 = arith.constant 0 : index
    %c0_12 = arith.constant 0 : index
    %25 = vector.load %arg5[%c0_11, %c0_12] : memref<64x128xf32, #tpu.memory_space<vmem>>, vector<64x128xf32>
    tpu.vector_store %arg5[%c0_11, %c0_12], %24 {strides = array<i32>} : memref<64x128xf32, #tpu.memory_space<vmem>>, vector<64x128xf32>,
    return
  }
  func.func @transform_0(%arg0: i32) -> (i32, i32, i32, i32) {
    %c0_i32 = arith.constant 0 : i32
    %c0_i32_0 = arith.constant 0 : i32
    %c0_i32_1 = arith.constant 0 : i32
    %c0_i32_2 = arith.constant 0 : i32
    return %arg0, %c0_i32, %c0_i32_0, %c0_i32_1 : i32, i32, i32, i32
  }
  func.func @transform_1(%arg0: i32) -> (i32, i32) {
    %c0_i32 = arith.constant 0 : i32
    %c0_i32_0 = arith.constant 0 : i32
    %c0_i32_1 = arith.constant 0 : i32
    return %c0_i32, %c0_i32_0 : i32, i32
  }
  func.func @transform_2(%arg0: i32) -> (i32, i32) {
    %c0_i32 = arith.constant 0 : i32
    %c0_i32_0 = arith.constant 0 : i32
    %c0_i32_1 = arith.constant 0 : i32
    return %c0_i32, %c0_i32_0 : i32, i32
  }
  func.func @transform_3(%arg0: i32) -> (i32, i32) {
    %c0_i32 = arith.constant 0 : i32
    %c0_i32_0 = arith.constant 0 : i32
    %c0_i32_1 = arith.constant 0 : i32
    return %c0_i32, %c0_i32_0 : i32, i32
  }
  func.func @transform_4(%arg0: i32) -> (i32, i32) {
    %c0_i32 = arith.constant 0 : i32
    %c0_i32_0 = arith.constant 0 : i32
    return %arg0, %c0_i32 : i32, i32
  }
}

</mosaic_0001>

<bundles_post_ra>
// kernel: tpu_custom_call.1
= control target key start
LH: loop header
LB: loop body
LE: loop exit
PB: predicated region body
PF: predicated region fallthrough
CT: control target
= control target key end

     0   :  { %9 = vsyncpa [#allocation3], 0  ;;  %s750_s0 = inlined_call_operand.vmem [shape: f32[16,2,8,8], index: 0, kind: input, shape index: {}]   ;;  %s751_s1 = inlined_call_operand.vmem [shape: f32[1,8], index: 1, kind: input, shape index: {}]   ;;  %s752_s2 = inlined_call_operand.vmem [shape: f32[1,8], index: 2, kind: input, shape index: {}]   ;;  %s753_s3 = inlined_call_operand.vmem [shape: f32[8,128], index: 3, kind: input, shape index: {}]   ;;  %s754_s4 = inlined_call_operand.hbm [shape: f32[128,128], index: 4, kind: output, shape index: {}]  }
   0x1   :  { %11 = vsyncpa [#allocation3 + $0x1], 0  ;;  %s595_s15 = smov 0   ;;  %s597_s16 = smov 0  }
   0x2   :  { %s599_s17 = smov 0   ;;  %s601_s18 = smov 0  }
   0x3 LB: > { %s616_s19 = sadd.s32 4294967295, %s566_s18   ;;  %s435_s20 = sadd.s32 4294967294, %s566_s18   ;;  %s566_s18 = sphi %s601_s18, %s760_s18   ;;  %s562_s17 = sphi %s599_s17, %s759_s17   ;;  %s558_s16 = sphi %s597_s16, %s758_s16   ;;  %s554_s15 = sphi %s595_s15, %s757_s15  }
   0x4   : > { %s620_s21 = sadd.s32 1, %s566_s18   ;;  %s113_s22 = sadd.s32 1, %s562_s17 }
   0x5   : > { %s110_s23 = ssub.s32 %s566_s18, %s620_s21  ;;  %p123_p0 = scmp.ne.s32.totalorder %s562_s17, %s558_s16 }
   0x6   : > { %p111_p1 = scmp.eq.s32.totalorder %s110_s23, 0  ;;  %p124_p2 = scmp.eq.s32.totalorder %s616_s19, 1 }
   0x7   : > { %p129_p3 = scmp.ne.s32.totalorder %s558_s16, %s554_s15  ;;  %p130_p4 = scmp.eq.s32.totalorder %s435_s20, 1 }
   0x8   : > { %s631_s24 = scalar_select %p111_p1, %s562_s17, %s113_s22  }
   0x9   : > { %p633_p5 = por %p124_p2, %p123_p0  ;;  %p637_p6 = por %p130_p4, %p129_p3 }
   0xa   : > { %p438_p7 = scmp.ge.s32.totalorder %s566_s18, 1  ;;  %p167_p8 = scmp.lt.s32.totalorder %s566_s18, 3 }
   0xc   : > { %p168_p9 = pnand %p438_p7, %p167_p8 }
   0xd   : > { %s440_s29 = sshll.u32 (!%p168_p9), %s616_s19, 3  ;;  %s191_s12 = sand.u32 (!%p168_p9), 1, %s558_s16  }
   0xe   : > { %171 = sbr.rel (%p168_p9) target bundleno = 176 (0xb0), region = 36  ;;  %p195_p10 = scmp.lt.s32.totalorder (!%p168_p9), %s440_s29, 15 }
   0xf   : > { %s439_s13 = sshll.u32 (!%p168_p9), %s191_s12, 6  ;;  %s457_s20 = sshll.u32 (!%p168_p9), %s616_s19, 6 }
  0x10   : > { %s193_s14 = scalar_lea.vmem (!%p168_p9), [#allocation2], %s439_s13  ;;  %s369_s27 = scalar_lea.hbm (!%p168_p9), %s754_s4, %s457_s20 }
  0x11   : > { %s370_s28 = sshll.u32 (!%p168_p9), %s193_s14, 4  ;;  %s358_s19 = scalar_lea.sflag (!%p168_p9), [#allocation3], %s191_s12  ;;  %s371_s28 = int_to_ptr.vmem [resolvable:$true] %s370_s28 }
  0x12   : > { %s524_s8 = scalar_lea.hbm (!%p168_p9), %s754_s4, 128 }
  0x13   : > { %v282_v0 = vld [vmem:[%s753_s3] sm:$0xff]  ;;  %s762_s29 = smov (!%p195_p10, %s440_s29), 15  ;;  %vm283_vm0 = vcmask 64512  }
  0x14   : > { %459 = vmatpush.msra.mxu2 %v282_v0  ;;  %460 = vmatpush.msra.mxu3 %v282_v0  ;;  %v650_v1 = vld [vmem:[%s751_s1] ss:$0 sm:$0xff]  ;;  %s456_s6 = sshll.u32 %s762_s29, 4  ;;  %s372_s29 = sshll.u32 %s369_s27, 4  ;;  %s373_s29 = int_to_ptr.hbm [resolvable:$true] %s372_s29 }
  0x15   : > { %323 = vmatpush.msra.mxu0 %v282_v0  ;;  %458 = vmatpush.msra.mxu1 %v282_v0  ;;  %s655_s9 = scalar_lea.vmem %s750_s0, %s456_s6  ;;  %v660_v2 = vld [vmem:[%s752_s2] ss:$0 sm:$0xff]  ;;  %s518_s30 = sshra.s32 %s373_s29, 4  ;;  %s519_s30 = int_to_ptr.hbm [resolvable:$true] %s518_s30 }
  0x16   : > { %v210_v3 = vld [vmem:[%s655_s9 + $0x40] sm:$0xff]  ;;  %v211_v4 = vld [vmem:[%s655_s9 + $0x48] sm:$0xff]  ;;  %v212_v25 = vld [vmem:[%s655_s9 + $0x50] sm:$0xff]  ;;  %s520_s5 = scalar_lea.hbm %s519_s30, 64  ;;  %p525_p0 = scmp.lt.s32.totalorder %s519_s30, %s754_s4 }
  0x17   : > { %v214_v5 = vld [vmem:[%s655_s9 + $0x60] sm:$0xff]  ;;  %v230_v6 = vmul.f32 %v650_v1, %v210_v3  ;;  %v254_v7 = vmul.f32 %v650_v1, %v211_v4  ;;  %v215_v8 = vld [vmem:[%s655_s9 + $0x68] sm:$0xff]  ;;  %v213_v26 = vld [vmem:[%s655_s9 + $0x58] sm:$0xff]  ;;  %v231_v40 = vmul.f32 %v650_v1, %v212_v25  ;;  %p521_p11 = scmp.ne.s32.totalorder %s519_s30, %s520_s5  ;;  %p526_p1 = scmp.lt.s32.totalorder %s524_s8, %s520_s5 }
  0x18   : > { %v232_v9 = vmul.f32 %v650_v1, %v214_v5  ;;  %v202_v10 = vld [vmem:[%s655_s9] sm:$0xff]  ;;  %v203_v11 = vld [vmem:[%s655_s9 + $0x8] sm:$0xff]  ;;  %v256_v12 = vmul.f32 %v650_v1, %v215_v8  ;;  %v216_v31 = vld [vmem:[%s655_s9 + $0x70] sm:$0xff]  ;;  %v255_v41 = vmul.f32 %v650_v1, %v213_v26 }
  0x19   : > { %v226_v13 = vmul.f32 %v650_v1, %v202_v10  ;;  %v250_v14 = vmul.f32 %v650_v1, %v203_v11  ;;  %v206_v15 = vld [vmem:[%s655_s9 + $0x20] sm:$0xff]  ;;  %v207_v16 = vld [vmem:[%s655_s9 + $0x28] sm:$0xff]  ;;  %v238_v17 = vadd.f32 %v660_v2, %v230_v6  ;;  %v262_v18 = vadd.f32 %v660_v2, %v254_v7  ;;  %v217_v36 = vld [vmem:[%s655_s9 + $0x78] sm:$0xff]  ;;  %p522_p12 = pnand %p521_p11, %p633_p5  ;;  %p527_p2 = por %p526_p1, %p525_p0 }
  0x1a   : > { %v240_v19 = vadd.f32 %v660_v2, %v232_v9  ;;  %v228_v20 = vmul.f32 %v650_v1, %v206_v15  ;;  %v264_v21 = vadd.f32 %v660_v2, %v256_v12  ;;  %v252_v24 = vmul.f32 %v650_v1, %v207_v16  ;;  %v204_v37 = vld [vmem:[%s655_s9 + $0x10] sm:$0xff]  ;;  %v205_v42 = vld [vmem:[%s655_s9 + $0x18] sm:$0xff] }
  0x1b   : > { %v234_v22 = vadd.f32 %v660_v2, %v226_v13  ;;  %v258_v23 = vadd.f32 %v660_v2, %v250_v14  ;;  %v246_v27 = vmax.f32 %v238_v17, 0.0  ;;  %v270_v28 = vmax.f32 %v262_v18, 0.0  ;;  %v208_v51 = vld [vmem:[%s655_s9 + $0x30] sm:$0xff]  ;;  %v209_v52 = vld [vmem:[%s655_s9 + $0x38] sm:$0xff]  ;;  %p523_p13 = pneg %p522_p12 }
  0x1c   : > { %v248_v29 = vmax.f32 %v240_v19, 0.0  ;;  %v236_v30 = vadd.f32 %v660_v2, %v228_v20  ;;  %v272_v32 = vmax.f32 %v264_v21, 0.0  ;;  %v260_v35 = vadd.f32 %v660_v2, %v252_v24 }
  0x1d   : > { %v242_v33 = vmax.f32 %v234_v22, 0.0  ;;  %v266_v34 = vmax.f32 %v258_v23, 0.0  ;;  %v278_v38 = vadd.f32 %v270_v28, %v246_v27  ;;  %v233_v46 = vmul.f32 %v650_v1, %v216_v31  ;;  %p528_p3 = pnand %p527_p2, %p523_p13 }
  0x1e   : > { %v244_v39 = vmax.f32 %v236_v30, 0.0  ;;  %v280_v43 = vadd.f32 %v272_v32, %v248_v29  ;;  %v268_v45 = vmax.f32 %v260_v35, 0.0  ;;  %v239_v47 = vadd.f32 %v660_v2, %v231_v40 }
  0x1f   : > { %v274_v44 = vadd.f32 %v266_v34, %v242_v33  ;;  %447 = vmatmul.msk.f32.vlgmr.msra.gmra.mxu2 %vm283_vm0, %v278_v38  ;;  %v263_v48 = vadd.f32 %v660_v2, %v255_v41  ;;  %v257_v49 = vmul.f32 %v650_v1, %v217_v36  ;;  %v227_v50 = vmul.f32 %v650_v1, %v204_v37 }
  0x20   : > { %449 = vmatmul.msk.f32.vlgmr.msra.gmra.mxu3 %vm283_vm0, %v280_v43  ;;  %v276_v53 = vadd.f32 %v268_v45, %v244_v39  ;;  %v241_v54 = vadd.f32 %v660_v2, %v233_v46  ;;  %v251_v55 = vmul.f32 %v650_v1, %v205_v42  ;;  %v247_v56 = vmax.f32 %v239_v47, 0.0 }
  0x21   : > { %443 = vmatmul.msk.f32.vlgmr.msra.gmra.mxu0 %vm283_vm0, %v274_v44  ;;  %v271_v57 = vmax.f32 %v263_v48, 0.0  ;;  %v265_v58 = vadd.f32 %v660_v2, %v257_v49  ;;  %v235_v59 = vadd.f32 %v660_v2, %v227_v50  ;;  %v229_v62 = vmul.f32 %v650_v1, %v208_v51 }
  0x22   : > { %445 = vmatmul.msk.f32.vlgmr.msra.gmra.mxu1 %vm283_vm0, %v276_v53  ;;  %v249_v60 = vmax.f32 %v241_v54, 0.0  ;;  %v259_v61 = vadd.f32 %v660_v2, %v251_v55  ;;  %v253_v63 = vmul.f32 %v650_v1, %v209_v52 }
  0x23   : > { %v279_v0 = vadd.f32 %v271_v57, %v247_v56  ;;  %v273_v3 = vmax.f32 %v265_v58, 0.0  ;;  %v243_v4 = vmax.f32 %v235_v59, 0.0  ;;  %v237_v6 = vadd.f32 %v660_v2, %v229_v62 }
  0x24   : > { %v267_v5 = vmax.f32 %v259_v61, 0.0  ;;  %v261_v7 = vadd.f32 %v660_v2, %v253_v63 }
  0x25   : > { %v281_v8 = vadd.f32 %v273_v3, %v249_v60  ;;  %v245_v10 = vmax.f32 %v237_v6, 0.0 }
  0x26   : > { %v275_v9 = vadd.f32 %v267_v5, %v243_v4  ;;  %v269_v11 = vmax.f32 %v261_v7, 0.0 }
  0x27   : > { %448 = vmatmul.msk.f32.gmra.mxu2 %vm283_vm0, %v279_v0 }
  0x28   : > { %450 = vmatmul.msk.f32.gmra.mxu3 %vm283_vm0, %v281_v8  ;;  %v277_v1 = vadd.f32 %v269_v11, %v245_v10 }
  0x29   : > { %444 = vmatmul.msk.f32.gmra.mxu0 %vm283_vm0, %v275_v9 }
  0x2a   : > { %446 = vmatmul.msk.f32.gmra.mxu1 %vm283_vm0, %v277_v1 }
  0x9e   : > { %v325_v12 = vpop.f32.mrf.mxu0 }
  0x9f   : > { %349 = vst [vmem:[%s193_s14] sm:$0xff] %v325_v12  ;;  %v331_v2 = vpop.f32.mrf.mxu1 }
  0xa0   : > { %351 = vst [vmem:[%s193_s14 + $0x10] sm:$0xff] %v331_v2 }
  0xa2   : > { %v337_v13 = vpop.f32.mrf.mxu2 }
  0xa3   : > { %353 = vst [vmem:[%s193_s14 + $0x20] sm:$0xff] %v337_v13  ;;  %v343_v14 = vpop.f32.mrf.mxu3 }
  0xa4   : > { %355 = vst [vmem:[%s193_s14 + $0x30] sm:$0xff] %v343_v14 }
  0xa6   : > { %v328_v15 = vpop.f32.mrf.mxu0 }
  0xa7   : > { %350 = vst [vmem:[%s193_s14 + $0x8] sm:$0xff] %v328_v15  ;;  %v334_v16 = vpop.f32.mrf.mxu1 }
  0xa8   : > { %352 = vst [vmem:[%s193_s14 + $0x18] sm:$0xff] %v334_v16 }
  0xaa   : > { %v340_v17 = vpop.f32.mrf.mxu2 }
  0xab   : > { %354 = vst [vmem:[%s193_s14 + $0x28] sm:$0xff] %v340_v17  ;;  %v346_v18 = vpop.f32.mrf.mxu3 }
  0xac   : > { %356 = vst [vmem:[%s193_s14 + $0x38] sm:$0xff] %v346_v18 }
  0xad   : > { %531 = shalt.err (!%p528_p3)
}
  0xae   : > { %s568_s11 = smov 128   ;;  %s569_s12 = smov 8  }
  0xaf   : > { %461 = dma.vmem_to_hbm [thread:$0]  (%p633_p5), %s371_s28, 1024, %s373_s29, %s358_s19, %s568_s11, %s568_s11, %s569_s12  }
  0xb0 PF: > { %p467_p4 = scmp.ge.s32.totalorder %s566_s18, 2  ;;  %s387_s13 = sand.u32 1, %s554_s15  }
  0xb1   : > { %s388_s14 = scalar_lea.sflag [#allocation3], %s387_s13 }
  0xb2   : > { %p464_p7 = pnand %p467_p4, %p637_p6 }
  0xb4   : > { %p465_p8 = pneg %p464_p7 }
  0xb6   : > { %549 = dma.done.wait (%p465_p8), %s388_s14, 1024  }
  0xb7   : > { %551 = vsyncadd (%p465_p8), %s388_s14, 4294966272  ;;  %p14_p9 = scmp.ge.s32.totalorder %s620_s21, 4   ;;  %s757_s15 = smov %s558_s16 }
  0xb8   : > { %s758_s16 = smov %s562_s17  ;;  %s759_s17 = smov %s631_s24 }
  0xb9   : > { %s760_s18 = smov %s620_s21  ;;  %16 = sbr.rel (!%p14_p9) target bundleno = 3 (0x3), region = 71 }
  0xbe   :  { %394 = vsyncpa [#allocation3], 1 }
  0xbf   :  { %396 = vsyncpa [#allocation3 + $0x1], 1 }

</bundles_post_ra>
